<compile_context>
chip_gen: v5e
topology: v5e:2x2
jax: 0.10.0
libtpu: 0.0.40
codegen_flags: <defaults>
</compile_context>

<pallas_src>
import jax
import jax.numpy as jnp
from jax.experimental import pallas as pl
from jax.experimental.pallas import tpu as pltpu


def _mean_act_kernel(x_ref, o_ref):
    x = x_ref[...]
    # exp in f32 (uniform accuracy; v5e has no bf16 EUP path), clamp on the
    # VPU, cast back to output dtype.
    # TODO(synk): native bf16 exp on v6e/v7x would save two casts per element.
    y = jnp.exp(x.astype(jnp.float32))
    y = jnp.clip(y, 1e-05, 1e6)
    o_ref[...] = y.astype(o_ref.dtype)


def _round_up(a, m):
    return -(-a // m) * m


def _lane_dense_width(n):
    """Largest multiple-of-128 lane width (<=1024) that evenly divides n."""
    for lane in (1024, 512, 256, 128):
        if n % lane == 0:
            return lane
    return None


def mean_act(x, *, vmem_budget_bytes=16 * 1024 * 1024):
    """Elementwise MeanAct: clamp(exp(x), 1e-5, 1e6), any-rank input."""
    orig_shape = x.shape
    n_total = x.size
    itemsize = jnp.dtype(x.dtype).itemsize
    # Sublane packing multiple for the second-to-last block dim.
    sub = {4: 8, 2: 16, 1: 32}.get(itemsize, 8)

    last_dim = orig_shape[-1] if x.ndim >= 1 else 1
    needs_flatten = (x.ndim <= 1) or (last_dim % 128 != 0)
    lane = _lane_dense_width(n_total) if needs_flatten else None

    if lane is not None:
        # Lane-dense view: unmasked full-lane stores, contiguous DMA.
        x2 = x.reshape(n_total // lane, lane)
    elif x.ndim <= 1:
        # Fallback for ragged 1-D sizes (correct, but wastes sublanes).
        x2 = x.reshape(1, -1)
    else:
        # Keep the native last dim (full-dim block is exempt from the 128
        # divisibility rule; tail lanes are masked by Pallas block padding).
        x2 = x.reshape(-1, last_dim)

    B, F = x2.shape
    total_bytes = B * F * itemsize

    if total_bytes <= 256 * 1024:
        # Tiny input: one grid step, whole array as a single block
        # (full-dim blocks are exempt from the (8,128) constraint).
        tile_rows = B
        grid = (1,)
    else:
        # VMEM per row of a block: input + output, each double-buffered (~4x).
        bytes_per_row = max(1, F * itemsize * 4)
        max_rows = max(sub, (vmem_budget_bytes // bytes_per_row) // sub * sub)
        # At least 2 (even) steps so both v7x TensorCores run and read/write
        # DMA overlap; then rebalance tile_rows so the tail block isn't empty.
        steps = max(2, pl.cdiv(B, max_rows))
        steps += steps % 2
        tile_rows = _round_up(pl.cdiv(B, steps), sub)
        tile_rows = max(sub, min(tile_rows, max_rows))
        if tile_rows >= B:
            tile_rows = B
            grid = (1,)
        else:
            grid = (pl.cdiv(B, tile_rows),)

    out = pl.pallas_call(
        _mean_act_kernel,
        out_shape=jax.ShapeDtypeStruct((B, F), x2.dtype),
        grid_spec=pltpu.PrefetchScalarGridSpec(
            num_scalar_prefetch=0,
            grid=grid,
            in_specs=[pl.BlockSpec((tile_rows, F), lambda i: (i, 0))],
            out_specs=pl.BlockSpec((tile_rows, F), lambda i: (i, 0)),
        ),
        compiler_params=pltpu.CompilerParams(
            dimension_semantics=("parallel",),
            # Explicit limit: above v5e's 16 MiB scoped default, below v7x's
            # 64 MiB physical VMEM; plenty for ~4 MiB double-buffered blocks.
            vmem_limit_bytes=32 * 1024 * 1024,
        ),
        cost_estimate=pl.CostEstimate(
            flops=2 * B * F,              # clamp: 2 compare/select per elem
            transcendentals=B * F,        # one exp per elem
            bytes_accessed=2 * B * F * itemsize,
        ),
    )(x2)
    return out.reshape(orig_shape)


def _ref(x):
    return jnp.clip(jnp.exp(x.astype(jnp.float32)), 1e-05, 1e6).astype(x.dtype)


if __name__ == "__main__":
    key = jax.random.PRNGKey(0)
    k1, k2, k3, k4 = jax.random.split(key, 4)

    # 4-D input, last dim 16 (not a 128 multiple) -> lane-dense flatten path.
    x_nd = jax.random.normal(k1, (2, 4, 16, 16), dtype=jnp.float32) * 3.0
    out_nd = jax.block_until_ready(mean_act(x_nd))
    assert out_nd.shape == x_nd.shape and out_nd.dtype == x_nd.dtype
    assert jnp.allclose(out_nd, _ref(x_nd), rtol=1e-6, atol=1e-6)

    # Ragged shape (neither axis 128-aligned, total not divisible by 128) ->
    # fallback (-1, F) view; values exercising both clamp bounds.
    x_odd = jax.random.normal(k2, (13, 200), dtype=jnp.float32) * 3.0
    x_odd = x_odd.at[0, 0].set(100.0)    # exp -> inf -> clamped to 1e6
    x_odd = x_odd.at[1, 1].set(-50.0)    # exp -> ~2e-22 -> clamped to 1e-5
    out_odd = jax.block_until_ready(mean_act(x_odd))
    assert out_odd.shape == x_odd.shape and out_odd.dtype == x_odd.dtype
    assert jnp.allclose(out_odd, _ref(x_odd), rtol=1e-6, atol=1e-6)
    assert out_odd[0, 0] == 1e6 and out_odd[1, 1] == 1e-5

    # 1-D input -> lane-dense flatten (no (1, N) sublane waste).
    x_1d = jax.random.normal(k3, (4096,), dtype=jnp.float32) * 2.0
    out_1d = jax.block_until_ready(mean_act(x_1d))
    assert out_1d.shape == x_1d.shape
    assert jnp.allclose(out_1d, _ref(x_1d), rtol=1e-6, atol=1e-6)

    # Mid-size input (> 256 KiB) -> multi-step, balanced, even grid.
    x_big = jax.random.normal(k4, (1024, 512), dtype=jnp.float32) * 3.0
    out_big = jax.block_until_ready(mean_act(x_big))
    assert out_big.shape == x_big.shape
    assert jnp.allclose(out_big, _ref(x_big), rtol=1e-6, atol=1e-6)

    print("KERNEL_OK")
</pallas_src>

<mosaic_0001>
module attributes {stable_mosaic.version = 11 : i64} {
  func.func @_mean_act_kernel(%arg0: i32, %arg1: memref<2x1024xf32, #tpu.memory_space<vmem>>, %arg2: memref<2x1024xf32, #tpu.memory_space<vmem>>) attributes {dimension_semantics = [#tpu.dimension_semantics<parallel>], iteration_bounds = array<i64: 1>, scalar_prefetch = 0 : i64, scratch_operands = 0 : i64, tpu.core_type = #tpu.core_type<tc>, window_params = [{transform_indices = @transform_0, window_bounds = array<i64: 2, 1024>}, {transform_indices = @transform_1, window_bounds = array<i64: 2, 1024>}]} {
    %c0 = arith.constant 0 : index
    %c0_0 = arith.constant 0 : index
    %0 = vector.load %arg1[%c0, %c0_0] : memref<2x1024xf32, #tpu.memory_space<vmem>>, vector<2x1024xf32>
    %1 = math.exp %0 : vector<2x1024xf32>
    %cst = arith.constant 9.99999974E-6 : f32
    %cst_1 = arith.constant 1.000000e+06 : f32
    %2 = vector.broadcast %cst : f32 to vector<2x1024xf32>
    %3 = arith.maximumf %2, %1 : vector<2x1024xf32>
    %4 = vector.broadcast %cst_1 : f32 to vector<2x1024xf32>
    %5 = arith.minimumf %4, %3 : vector<2x1024xf32>
    %c0_2 = arith.constant 0 : index
    %c0_3 = arith.constant 0 : index
    %6 = vector.load %arg2[%c0_2, %c0_3] : memref<2x1024xf32, #tpu.memory_space<vmem>>, vector<2x1024xf32>
    tpu.vector_store %arg2[%c0_2, %c0_3], %5 {strides = array<i32>} : memref<2x1024xf32, #tpu.memory_space<vmem>>, vector<2x1024xf32>,
    return
  }
  func.func @transform_0(%arg0: i32) -> (i32, i32) {
    %c0_i32 = arith.constant 0 : i32
    %c0_i32_0 = arith.constant 0 : i32
    return %arg0, %c0_i32 : i32, i32
  }
  func.func @transform_1(%arg0: i32) -> (i32, i32) {
    %c0_i32 = arith.constant 0 : i32
    %c0_i32_0 = arith.constant 0 : i32
    return %arg0, %c0_i32 : i32, i32
  }
}

</mosaic_0001>

<bundles_post_ra>
// kernel: tpu_custom_call.1
= control target key start
LH: loop header
LB: loop body
LE: loop exit
PB: predicated region body
PF: predicated region fallthrough
CT: control target
= control target key end

     0   :  { %6 = vsyncpa [#allocation3], 0  ;;  %s128_s0 = inlined_call_operand.hbm [shape: f32[2,1024], index: 0, kind: input, shape index: {}]   ;;  %s129_s1 = inlined_call_operand.hbm [shape: f32[2,1024], index: 1, kind: output, shape index: {}]  }
   0x1   :  { %7 = vsyncpa [#allocation4], 0  ;;  %s13_s8 = sshll.u32 %s128_s0, 4  ;;  %s110_s9 = smov [#allocation2]   ;;  %s14_s8 = int_to_ptr.hbm [resolvable:$true] %s13_s8 }
   0x2   :  { %s15_s10 = sshll.u32 %s110_s9, 4  ;;  %s16_s10 = int_to_ptr.vmem [resolvable:$true] %s15_s10 }
   0x3   :  { %18 = dma.hbm_to_vmem [thread:$0]  %s14_s8, 256, %s16_s10, [#allocation3]  }
   0x4   :  { %106 = dma.done.wait [#allocation3], 256  }
   0x5   :  { %107 = vsyncadd [#allocation3], 4294967040  ;;  %v23_v0 = vld [vmem:[#allocation2] sm:$0xff]  ;;  %v24_v1 = vld [vmem:[#allocation2 + $0x8] sm:$0xff]  ;;  %s111_s11 = smov [#allocation5]   ;;  %s42_s14 = sshll.u32 %s129_s1, 4  ;;  %s43_s14 = int_to_ptr.hbm [resolvable:$true] %s42_s14 }
   0x6   :  { %v25_v2 = vmul.f32 1.442695, %v23_v0  ;;  %v27_v3 = vmul.f32 1.442695, %v24_v1  ;;  %s40_s12 = sshll.u32 %s111_s11, 4  ;;  %s41_s12 = int_to_ptr.vmem [resolvable:$true] %s40_s12 }
   0x8   :  { %54 = vpow2.f32 %v25_v2 }
   0x9   :  { %56 = vpow2.f32 %v27_v3 }
   0xe   :  { %v55_v4 = vpop.eup %54 }
   0xf   :  { %v57_v5 = vpop.eup %56  ;;  %v29_v6 = vmax.f32 %v55_v4, 1e-05 }
  0x10   :  { %v30_v7 = vmax.f32 %v57_v5, 1e-05 }
  0x11   :  { %v31_v8 = vmin.f32 %v29_v6, 1000000.0 }
  0x12   :  { %v32_v9 = vmin.f32 %v30_v7, 1000000.0 }
  0x13   :  { %33 = vst [vmem:[#allocation5] sm:$0xff] %v31_v8 }
  0x14   :  { %34 = vst [vmem:[#allocation5 + $0x8] sm:$0xff] %v32_v9 }
  0x15   :  { %45 = dma.vmem_to_hbm [thread:$0]  %s41_s12, 256, %s43_s14, [#allocation4]  }
  0x16   :  { %108 = dma.done.wait [#allocation4], 256  }
  0x17   :  { %109 = vsyncadd [#allocation4], 4294967040 }
  0x18   :  { %50 = vsyncpa [#allocation3], 1 }
  0x19   :  { %51 = vsyncpa [#allocation4], 1 }

</bundles_post_ra>
